<compile_context>
chip_gen: v7x
topology: tpu7x:2x2x1
jax: 0.10.0
libtpu: 0.0.40
codegen_flags: <defaults>
</compile_context>

<pallas_src>
import math

import jax
import jax.numpy as jnp
from jax.experimental import pallas as pl
from jax.experimental.pallas import tpu as pltpu


def _round_up(a: int, m: int) -> int:
    return ((a + m - 1) // m) * m


def time_mlp_kernel(x_ref, w_ref, b_ref, o_ref):
    # x_ref: (TM, Lp) f32 or bf16   packed activations
    # w_ref: (Lp, Lp) bf16          block-diagonal replication of W^T
    # b_ref: (1, Lp)  f32           tiled bias
    x = x_ref[...].astype(jnp.bfloat16)            # no-op when already bf16
    y = jnp.dot(x, w_ref[...], preferred_element_type=jnp.float32)
    o_ref[...] = jnp.maximum(y + b_ref[...], 0.0).astype(o_ref.dtype)


def pack_time_mlp_params(w, b):
    """Pack PyTorch-layout (out, in) weight + bias for the kernel.

    Hoist this out of per-step call paths: the result is call-invariant.
    Returns (w_pack bf16 (Lp,Lp), b_pack f32 (1,Lp), G, Lp).
    """
    L = w.shape[0]
    G = (128 // L) if (L < 128 and 128 % L == 0) else 1
    Lp = G * L
    wt = w.T.astype(jnp.float32)                               # y = x @ W^T
    if G > 1:
        w_pack = jnp.kron(jnp.eye(G, dtype=jnp.float32), wt)   # (Lp, Lp) block-diag
        b_pack = jnp.tile(b.astype(jnp.float32), (G,)).reshape(1, Lp)
    else:
        w_pack = wt
        b_pack = b.astype(jnp.float32).reshape(1, Lp)
    return w_pack.astype(jnp.bfloat16), b_pack, G, Lp


def mlp_time_block(x, w, b, *, block_rows=4096, out_dtype=None, packed=None):
    """ReLU(x @ W^T + b) over the last dim of x (eval-mode Dropout = identity).

    x: (..., L);  w: (L, L) PyTorch nn.Linear layout (out, in);  b: (L,).
    `packed` may carry a precomputed pack_time_mlp_params(w, b) result.
    """
    orig_shape = x.shape
    L = orig_shape[-1]
    M = math.prod(orig_shape[:-1])
    out_dtype = jnp.dtype(out_dtype) if out_dtype is not None else jnp.dtype(x.dtype)

    w_pack, b_pack, G, Lp = packed if packed is not None else pack_time_mlp_params(w, b)

    # Balanced row tiling over packed rows; >= 2 grid steps when possible so the
    # parallel axis spans both TensorCores on v7x.
    Mp0 = pl.cdiv(M, G)                                # packed rows needed
    nblocks = max(pl.cdiv(Mp0, block_rows), 1)
    if Mp0 >= 16:                                      # enough for two >=8-row tiles
        nblocks = max(nblocks, 2)
    TM = _round_up(pl.cdiv(Mp0, nblocks), 8)
    Mp = nblocks * TM

    # Pad + pack the activations: (M, L) -> (Mp, Lp).
    x_flat = x.reshape(M, L)
    pad_rows = Mp * G - M
    if pad_rows:
        # The pad/pack pass writes a fresh buffer anyway: fuse the bf16 cast in
        # so the kernel streams 2 B/elem on the input side (f32 acc unchanged).
        x_flat = jnp.pad(x_flat.astype(jnp.bfloat16), ((0, pad_rows), (0, 0)))
    else:
        x_flat = x_flat.astype(jnp.float32)
    x_pack = x_flat.reshape(Mp, Lp)

    bytes_accessed = (x_pack.size * x_pack.dtype.itemsize
                      + w_pack.size * w_pack.dtype.itemsize
                      + b_pack.size * b_pack.dtype.itemsize
                      + Mp * Lp * out_dtype.itemsize)
    cost = pl.CostEstimate(flops=2 * Mp * Lp * Lp, transcendentals=0,
                           bytes_accessed=bytes_accessed)

    out = pl.pallas_call(
        time_mlp_kernel,
        out_shape=jax.ShapeDtypeStruct((Mp, Lp), out_dtype),
        grid_spec=pltpu.PrefetchScalarGridSpec(
            num_scalar_prefetch=0,
            grid=(nblocks,),
            in_specs=[
                pl.BlockSpec((TM, Lp), lambda i: (i, 0)),   # activations (pipelined)
                pl.BlockSpec((Lp, Lp), lambda i: (0, 0)),   # packed W^T (grid-invariant)
                pl.BlockSpec((1, Lp), lambda i: (0, 0)),    # packed bias (grid-invariant)
            ],
            out_specs=pl.BlockSpec((TM, Lp), lambda i: (i, 0)),
        ),
        compiler_params=pltpu.CompilerParams(
            dimension_semantics=("parallel",)),
        cost_estimate=cost,
    )(x_pack, w_pack, b_pack)

    return out.reshape(Mp * G, L)[:M].reshape(orig_shape)


def mlp_time_block_ref_f32(x, w, b):
    """Pure-JAX f32 reference of the PyTorch forward (eval mode)."""
    return jnp.maximum(jnp.einsum("...l,ml->...m", x, w) + b, 0.0)


def mlp_time_block_ref_bf16(x, w, b):
    """Reference with the kernel's precision policy (bf16 operands, f32 acc)."""
    y = jnp.einsum("...l,ml->...m",
                   x.astype(jnp.bfloat16), w.astype(jnp.bfloat16),
                   preferred_element_type=jnp.float32)
    return jnp.maximum(y + b.astype(jnp.float32), 0.0)


if __name__ == "__main__":
    LOOKBACK = 16                      # MLPTimeBlock(features=LOOKBACK)
    key = jax.random.PRNGKey(0)
    kx1, kx2, kw, kb = jax.random.split(key, 4)

    lim = 1.0 / math.sqrt(LOOKBACK)    # PyTorch nn.Linear default init range
    w = jax.random.uniform(kw, (LOOKBACK, LOOKBACK), minval=-lim, maxval=lim,
                           dtype=jnp.float32)
    b = jax.random.uniform(kb, (LOOKBACK,), minval=-lim, maxval=lim,
                           dtype=jnp.float32)
    packed = pack_time_mlp_params(w, b)   # hoisted / reusable across calls

    # Case 1: (B, C, L) = (2, 8, 16) -- exercises the padded, bf16-streamed path.
    x1 = jax.random.normal(kx1, (2, 8, LOOKBACK), dtype=jnp.float32)
    # Case 2: (B, C, L) = (4, 32, 16) -- no padding (f32 stream), 2 grid steps.
    x2 = jax.random.normal(kx2, (4, 32, LOOKBACK), dtype=jnp.float32)

    for x in (x1, x2):
        out = jax.block_until_ready(mlp_time_block(x, w, b, packed=packed))
        ref_bf16 = jax.block_until_ready(mlp_time_block_ref_bf16(x, w, b))
        ref_f32 = jax.block_until_ready(mlp_time_block_ref_f32(x, w, b))

        assert out.shape == x.shape and out.dtype == x.dtype
        # Strict check vs same-precision reference (bf16 MXU, f32 accumulate).
        err_strict = float(jnp.max(jnp.abs(out - ref_bf16)))
        assert jnp.allclose(out, ref_bf16, atol=1e-4, rtol=1e-4), err_strict
        # Loose check vs full-f32 PyTorch-equivalent math (bf16 rounding only).
        err_loose = float(jnp.max(jnp.abs(out - ref_f32)))
        assert jnp.allclose(out, ref_f32, atol=3e-2, rtol=3e-2), err_loose

    print("KERNEL_OK")
</pallas_src>

<mosaic_0001>
module attributes {stable_mosaic.version = 11 : i64} {
  func.func @time_mlp_kernel(%arg0: i32, %arg1: memref<8x128xbf16, #tpu.memory_space<vmem>>, %arg2: memref<128x128xbf16, #tpu.memory_space<vmem>>, %arg3: memref<1x128xf32, #tpu.memory_space<vmem>>, %arg4: memref<8x128xf32, #tpu.memory_space<vmem>>) attributes {dimension_semantics = [#tpu.dimension_semantics<parallel>], iteration_bounds = array<i64: 1>, scalar_prefetch = 0 : i64, scratch_operands = 0 : i64, tpu.core_type = #tpu.core_type<tc>, window_params = [{transform_indices = @transform_0, window_bounds = array<i64: 8, 128>}, {pipeline_mode = #tpu.pipeline_mode<synchronous>, transform_indices = @transform_1, window_bounds = array<i64: 128, 128>}, {pipeline_mode = #tpu.pipeline_mode<synchronous>, transform_indices = @transform_2, window_bounds = array<i64: 1, 128>}, {transform_indices = @transform_3, window_bounds = array<i64: 8, 128>}]} {
    %c0 = arith.constant 0 : index
    %c0_0 = arith.constant 0 : index
    %0 = vector.load %arg1[%c0, %c0_0] : memref<8x128xbf16, #tpu.memory_space<vmem>>, vector<8x128xbf16>
    %c0_1 = arith.constant 0 : index
    %c0_2 = arith.constant 0 : index
    %1 = vector.load %arg2[%c0_1, %c0_2] : memref<128x128xbf16, #tpu.memory_space<vmem>>, vector<128x128xbf16>
    %cst = arith.constant dense<0.000000e+00> : vector<8x128xf32>
    %2 = tpu.matmul %0, %1, %cst {dimension_numbers = #tpu.dot_dimension_numbers<[1], [0], [0], [1], [0, 0, 1, 1], [], []>} : vector<8x128xbf16>, vector<128x128xbf16>, vector<8x128xf32> -> vector<8x128xf32>
    %c0_3 = arith.constant 0 : index
    %c0_4 = arith.constant 0 : index
    %3 = vector.load %arg3[%c0_3, %c0_4] : memref<1x128xf32, #tpu.memory_space<vmem>>, vector<1x128xf32>
    %4 = vector.broadcast %3 : vector<1x128xf32> to vector<8x128xf32>
    %5 = arith.addf %2, %4 : vector<8x128xf32>
    %cst_5 = arith.constant 0.000000e+00 : f32
    %6 = vector.broadcast %cst_5 : f32 to vector<8x128xf32>
    %7 = arith.maximumf %5, %6 : vector<8x128xf32>
    %c0_6 = arith.constant 0 : index
    %c0_7 = arith.constant 0 : index
    %8 = vector.load %arg4[%c0_6, %c0_7] : memref<8x128xf32, #tpu.memory_space<vmem>>, vector<8x128xf32>
    tpu.vector_store %arg4[%c0_6, %c0_7], %7 {strides = array<i32>} : memref<8x128xf32, #tpu.memory_space<vmem>>, vector<8x128xf32>,
    return
  }
  func.func @transform_0(%arg0: i32) -> (i32, i32) {
    %c0_i32 = arith.constant 0 : i32
    %c0_i32_0 = arith.constant 0 : i32
    return %arg0, %c0_i32 : i32, i32
  }
  func.func @transform_1(%arg0: i32) -> (i32, i32) {
    %c0_i32 = arith.constant 0 : i32
    %c0_i32_0 = arith.constant 0 : i32
    %c0_i32_1 = arith.constant 0 : i32
    return %c0_i32, %c0_i32_0 : i32, i32
  }
  func.func @transform_2(%arg0: i32) -> (i32, i32) {
    %c0_i32 = arith.constant 0 : i32
    %c0_i32_0 = arith.constant 0 : i32
    %c0_i32_1 = arith.constant 0 : i32
    return %c0_i32, %c0_i32_0 : i32, i32
  }
  func.func @transform_3(%arg0: i32) -> (i32, i32) {
    %c0_i32 = arith.constant 0 : i32
    %c0_i32_0 = arith.constant 0 : i32
    return %arg0, %c0_i32 : i32, i32
  }
}

</mosaic_0001>

<bundles_post_ra>
// kernel: tpu_custom_call.1
= control target key start
LH: loop header
LB: loop body
LE: loop exit
PB: predicated region body
PF: predicated region fallthrough
CT: control target
= control target key end

     0   :  { %8 = vsyncpa [#allocation3], 0  ;;  %s370_s0 = inlined_call_operand.hbm [shape: bf16[8,128], index: 0, kind: input, shape index: {}]   ;;  %s371_s1 = inlined_call_operand.hbm [shape: bf16[128,128], index: 1, kind: input, shape index: {}]   ;;  %s372_s2 = inlined_call_operand.vmem [shape: f32[1,128], index: 2, kind: input, shape index: {}]   ;;  %s373_s3 = inlined_call_operand.hbm [shape: f32[8,128], index: 3, kind: output, shape index: {}]  }
   0x1   :  { %9 = vsyncpa [#allocation6], 0 }
   0x2   :  { %10 = vsyncpa [#allocation4], 0  ;;  %s297_s12 = smov [#allocation2]   ;;  %s298_s14 = smov [#allocation5]  }
   0x3   :  { %s17_s13 = sshll.u32 %s297_s12, 4  ;;  %s26_s15 = sshll.u32 %s298_s14, 4  ;;  %s18_s13 = int_to_ptr.vmem [resolvable:$true] %s17_s13  ;;  %s324_s15 = int_to_ptr.vmem [resolvable:$true] %s26_s15 }
   0x4   :  { %s225_s18 = scalar_lea.hbm %s370_s0, 64 }
   0x5   :  { %p226_p0 = scmp.ne.s32.totalorder %s370_s0, %s225_s18  ;;  %p229_p1 = scmp.lt.u32.totalorder %s225_s18, %s370_s0 }
   0x7   :  { %p231_p2 = pnand %p229_p1, %p226_p0 }
   0x9   :  { %234 = shalt.err (!%p231_p2)
}
   0xa   :  { %s235_s23 = scalar_lea.vmem %s18_s13, 64  ;;  %p240_p4 = scmp.lt.s32.totalorder %s18_s13, %s18_s13 }
   0xb   :  { %p236_p3 = scmp.ne.s32.totalorder %s18_s13, %s235_s23  ;;  %p241_p5 = scmp.lt.s32.totalorder %s235_s23, %s235_s23 }
   0xd   :  { %p242_p6 = por %p241_p5, %p240_p4 }
   0xf   :  { %p243_p7 = pnand %p242_p6, %p236_p3 }
  0x11   :  { %246 = shalt.err (!%p243_p7)
}
  0x12   :  { %20 = dma.hbm_to_vmem [thread:$0]  %s370_s0, 64, %s18_s13, [#allocation3]  }
  0x13   :  { %s247_s28 = scalar_lea.hbm %s371_s1, 1024 }
  0x14   :  { %p248_p8 = scmp.ne.s32.totalorder %s371_s1, %s247_s28  ;;  %p251_p9 = scmp.lt.u32.totalorder %s247_s28, %s371_s1 }
  0x16   :  { %p253_p10 = pnand %p251_p9, %p248_p8 }
  0x18   :  { %256 = shalt.err (!%p253_p10)
}
  0x19   :  { %s257_s6 = scalar_lea.vmem %s324_s15, 1024  ;;  %p262_p12 = scmp.lt.s32.totalorder %s324_s15, %s324_s15 }
  0x1a   :  { %p258_p11 = scmp.ne.s32.totalorder %s324_s15, %s257_s6  ;;  %p263_p13 = scmp.lt.s32.totalorder %s257_s6, %s257_s6 }
  0x1c   :  { %p264_p0 = por %p263_p13, %p262_p12 }
  0x1e   :  { %p265_p1 = pnand %p264_p0, %p258_p11 }
  0x20   :  { %268 = shalt.err (!%p265_p1)
}
  0x21   :  { %s299_s0 = smov 64   ;;  %s300_s7 = smov 4  }
  0x22   :  { %32 = dma.hbm_to_vmem [thread:$0]  %s371_s1, 1024, %s324_s15, [#allocation6], %s299_s0, %s299_s0, %s300_s7  }
  0x23   :  { %291 = dma.done.wait [#allocation3], 64  }
  0x24   :  { %292 = vsyncadd [#allocation3], 4294967232 }
  0x25   :  { %293 = dma.done.wait [#allocation6], 1024  }
  0x26   :  { %294 = vsyncadd [#allocation6], 4294966272  ;;  %v301_v0 = vmov 0.0   ;;  %vm302_vm0 = vmmov 0   ;;  %v217_v1 = vld [vmem:[#allocation5] sm:$0xff]   ;;  %v218_v2 = vld [vmem:[#allocation5 + $0x8] sm:$0xff]  }
  0x27   :  { %190 = vmatprep.subr.bf16.mxu0 %v301_v0  ;;  %206 = vmatprep.mubr.msk.bf16.mxu0 %vm302_vm0, %v301_v0  ;;  %v219_v3 = vld [vmem:[#allocation5 + $0x10] sm:$0xff]   ;;  %v220_v4 = vld [vmem:[#allocation5 + $0x18] sm:$0xff]   ;;  %v221_v5 = vld [vmem:[#allocation5 + $0x20] sm:$0xff]   ;;  %s303_s11 = smov [#allocation7]  }
  0x28   :  { %191 = vmatpush3.bf16.msra.mxu0 %v217_v1  ;;  %v222_v6 = vld [vmem:[#allocation5 + $0x28] sm:$0xff]   ;;  %v223_v7 = vld [vmem:[#allocation5 + $0x30] sm:$0xff]   ;;  %v224_v8 = vld [vmem:[#allocation5 + $0x38] sm:$0xff]   ;;  %s162_s12 = sshll.u32 %s303_s11, 4  ;;  %s163_s12 = int_to_ptr.vmem [resolvable:$true] %s162_s12 }
  0x29   :  { %192 = vmatprep.subr.bf16.mxu0 %v301_v0  ;;  %v42_v9 = vld [vmem:[#allocation2] sm:$0xf]  ;;  %s269_s13 = scalar_lea.vmem %s163_s12, 128  ;;  %p274_p3 = scmp.lt.s32.totalorder %s163_s12, %s163_s12 }
  0x2a   :  { %v172_v10 = vld [vmem:[%s372_s2] ss:$0 sm:$0xff]  ;;  %p270_p2 = scmp.ne.s32.totalorder %s163_s12, %s269_s13  ;;  %p275_p4 = scmp.lt.s32.totalorder %s269_s13, %s269_s13 }
  0x2c   :  { %193 = vmatpush3.bf16.msra.mxu0 %v218_v2  ;;  %p276_p5 = por %p275_p4, %p274_p3 }
  0x2d   :  { %194 = vmatprep.subr.bf16.mxu0 %v301_v0 }
  0x2e   :  { %p277_p6 = pnand %p276_p5, %p270_p2 }
  0x30   :  { %195 = vmatpush3.bf16.msra.mxu0 %v219_v3 }
  0x31   :  { %196 = vmatprep.subr.bf16.mxu0 %v301_v0 }
  0x34   :  { %197 = vmatpush3.bf16.msra.mxu0 %v220_v4 }
  0x35   :  { %198 = vmatprep.subr.bf16.mxu0 %v301_v0 }
  0x38   :  { %199 = vmatpush3.bf16.msra.mxu0 %v221_v5 }
  0x39   :  { %200 = vmatprep.subr.bf16.mxu0 %v301_v0 }
  0x3c   :  { %201 = vmatpush3.bf16.msra.mxu0 %v222_v6 }
  0x3d   :  { %202 = vmatprep.subr.bf16.mxu0 %v301_v0 }
  0x40   :  { %203 = vmatpush3.bf16.msra.mxu0 %v223_v7 }
  0x41   :  { %204 = vmatprep.subr.bf16.mxu0 %v301_v0 }
  0x44   :  { %205 = vmatpush3.bf16.msra.mxu0 %v224_v8 }
  0x47   :  { %207 = vmatmul.mubr.bf16.vlgmr.msra.gmra.mrb[0].mxu0 %v42_v9 }
 0x11a   :  { %v148_v11 = vpop.f32.mrb[0].mxu0 }
 0x11b   :  { %v149_v12 = vadd.f32 %v172_v10, %v148_v11  ;;  %v208_v13 = vpop.f32.mrb[1].mxu0 }
 0x11c   :  { %v151_v14 = vpop.f32.mrb[2].mxu0 }
 0x11d   :  { %v154_v15 = vmax.f32 %v149_v12, 0.0  ;;  %v209_v16 = vpop.f32.mrb[3].mxu0 }
 0x11f   :  { %155 = vst [vmem:[#allocation7] sm:$0xff] %v154_v15 }
 0x120   :  { %280 = shalt.err (!%p277_p6)
}
 0x121   :  { %s281_s2 = scalar_lea.hbm %s373_s3, 128 }
 0x122   :  { %p282_p7 = scmp.ne.s32.totalorder %s373_s3, %s281_s2  ;;  %p285_p8 = scmp.lt.u32.totalorder %s281_s2, %s373_s3 }
 0x124   :  { %p287_p9 = pnand %p285_p8, %p282_p7 }
 0x126   :  { %290 = shalt.err (!%p287_p9)
}
 0x127   :  { %165 = dma.vmem_to_hbm [thread:$0]  %s163_s12, 128, %s373_s3, [#allocation4]  }
 0x128   :  { %295 = dma.done.wait [#allocation4], 128  }
 0x129   :  { %296 = vsyncadd [#allocation4], 4294967168 }
 0x12a   :  { %169 = vsyncpa [#allocation3], 1 }
 0x12b   :  { %170 = vsyncpa [#allocation6], 1 }
 0x12c   :  { %171 = vsyncpa [#allocation4], 1 }

</bundles_post_ra>
